<compile_context>
chip_gen: v5e
topology: v5e:2x2
jax: 0.10.0
libtpu: 0.0.40
codegen_flags: <defaults>
</compile_context>

<pallas_src>
import jax
import jax.numpy as jnp
from jax.experimental import pallas as pl
from jax.experimental.pallas import tpu as pltpu

K = 28 * 28          # 784
K_PAD = 896          # 7 * 128  (zero-padded reduction dim)
N1 = 128             # hidden width
N2 = 10              # logits
N2_PAD = 128         # lane-dense padded output width


def _mlp_kernel(x_ref, w1_ref, b1_ref, w2_ref, b2_ref, out_ref):
    # One batch tile per grid step: two MXU matmuls (bf16 operands, f32 acc)
    # fused with f32 bias + ReLU; intermediate h stays in vregs (no scratch).
    x = x_ref[...]                        # (TB, 896)  bf16
    w1 = w1_ref[...]                      # (896, 128) bf16
    h = jnp.dot(x, w1, preferred_element_type=jnp.float32) + b1_ref[...]   # f32
    h = jnp.maximum(h, 0.0)               # ReLU in f32 (v5e-friendly epilogue)
    h = h.astype(jnp.bfloat16)            # bf16 operand for second MXU pass
    out = jnp.dot(h, w2_ref[...], preferred_element_type=jnp.float32) + b2_ref[...]
    out_ref[...] = out.astype(out_ref.dtype)   # (TB, 128) lane-dense store


def _round_up(n, m):
    return -(-n // m) * m


def simple_nn_forward(x_nchw, w1, b1, w2, b2, *, tb=512):
    """Forward pass of SimpleNN.

    x_nchw: (B, 1, 28, 28) float32 (NCHW, like PyTorch)
    w1: (784, 128), b1: (1, 128), w2: (128, 10), b2: (1, 10)   (all float32)
    returns: (B, 10) float32 logits
    """
    B = x_nchw.shape[0]
    x_flat = x_nchw.reshape(B, -1).astype(jnp.float32)          # nn.Flatten: (B, 784)

    # Pad K to a clean multiple of 128 (zeros don't change the result).
    x_flat = jnp.pad(x_flat, ((0, 0), (0, K_PAD - K)))

    # Tile the batch: TB multiple of 8, batch padded up to a multiple of TB.
    b8 = _round_up(B, 8)
    TB = _round_up(min(tb, b8), 8)
    B_pad = _round_up(b8, TB)
    if B_pad != B:
        x_flat = jnp.pad(x_flat, ((0, B_pad - B), (0, 0)))

    # bf16 MXU operands; biases stay f32 (f32 accumulate + epilogue).
    xb = x_flat.astype(jnp.bfloat16)                                       # (B_pad, 896)
    w1p = jnp.pad(w1, ((0, K_PAD - K), (0, 0))).astype(jnp.bfloat16)       # (896, 128)
    w2p = jnp.pad(w2, ((0, 0), (0, N2_PAD - N2))).astype(jnp.bfloat16)     # (128, 128)
    b1p = b1.astype(jnp.float32)                                           # (1, 128)
    b2p = jnp.pad(b2, ((0, 0), (0, N2_PAD - N2))).astype(jnp.float32)      # (1, 128)

    grid = (B_pad // TB,)
    out = pl.pallas_call(
        _mlp_kernel,
        out_shape=jax.ShapeDtypeStruct((B_pad, N2_PAD), jnp.float32),
        grid=grid,
        in_specs=[
            pl.BlockSpec((TB, K_PAD), lambda i: (i, 0)),       # x tile: pipelined
            pl.BlockSpec((K_PAD, N1), lambda i: (0, 0)),       # w1: VMEM-resident
            pl.BlockSpec((1, N1), lambda i: (0, 0)),           # b1
            pl.BlockSpec((N1, N2_PAD), lambda i: (0, 0)),      # w2 (padded)
            pl.BlockSpec((1, N2_PAD), lambda i: (0, 0)),       # b2 (padded)
        ],
        out_specs=pl.BlockSpec((TB, N2_PAD), lambda i: (i, 0)),
        compiler_params=pltpu.CompilerParams(
            dimension_semantics=("parallel",)),
        cost_estimate=pl.CostEstimate(
            flops=2 * B_pad * (K_PAD * N1 + N1 * N2_PAD),
            bytes_accessed=(B_pad * K_PAD * 2            # x (bf16)
                            + K_PAD * N1 * 2             # w1 (bf16)
                            + N1 * N2_PAD * 2            # w2 (bf16)
                            + (N1 + N2_PAD) * 4          # biases
                            + B_pad * N2_PAD * 4),       # out (f32)
            transcendentals=0),
    )(xb, w1p, b1p, w2p, b2p)

    return out[:B, :N2]


def init_params(key):
    """Deterministic init matching PyTorch nn.Linear default shapes.

    fc1: Linear(784, 128) -> weight (784, 128) [transposed vs torch], bias (1, 128)
    fc2: Linear(128, 10)  -> weight (128, 10),  bias (1, 10)
    Init: uniform(-1/sqrt(fan_in), 1/sqrt(fan_in)) like torch's default.
    """
    k1, k2, k3, k4 = jax.random.split(key, 4)
    lim1 = 1.0 / jnp.sqrt(784.0)
    lim2 = 1.0 / jnp.sqrt(128.0)
    w1 = jax.random.uniform(k1, (784, 128), jnp.float32, -lim1, lim1)
    b1 = jax.random.uniform(k2, (1, 128), jnp.float32, -lim1, lim1)
    w2 = jax.random.uniform(k3, (128, 10), jnp.float32, -lim2, lim2)
    b2 = jax.random.uniform(k4, (1, 10), jnp.float32, -lim2, lim2)
    return w1, b1, w2, b2


if __name__ == "__main__":
    key = jax.random.PRNGKey(0)
    k_x, k_p = jax.random.split(key)

    B = 8
    x = jax.random.normal(k_x, (B, 1, 28, 28), jnp.float32)  # NCHW, MNIST-like
    w1, b1, w2, b2 = init_params(k_p)

    out = simple_nn_forward(x, w1, b1, w2, b2)
    out = jax.block_until_ready(out)

    # Reference on the same math path (bf16-rounded operands, f32 accumulation).
    xb = x.reshape(B, -1).astype(jnp.bfloat16).astype(jnp.float32)
    w1b = w1.astype(jnp.bfloat16).astype(jnp.float32)
    w2b = w2.astype(jnp.bfloat16).astype(jnp.float32)
    ref = jnp.maximum(xb @ w1b + b1, 0.0) @ w2b + b2

    assert out.shape == (B, 10)
    assert jnp.allclose(out, ref, atol=1e-2, rtol=1e-2)

    print("KERNEL_OK")
</pallas_src>

<mosaic_0001>
module attributes {stable_mosaic.version = 11 : i64} {
  func.func @_mlp_kernel(%arg0: i32, %arg1: memref<8x896xbf16, #tpu.memory_space<vmem>>, %arg2: memref<896x128xbf16, #tpu.memory_space<vmem>>, %arg3: memref<1x128xf32, #tpu.memory_space<vmem>>, %arg4: memref<128x128xbf16, #tpu.memory_space<vmem>>, %arg5: memref<1x128xf32, #tpu.memory_space<vmem>>, %arg6: memref<8x128xf32, #tpu.memory_space<vmem>>) attributes {dimension_semantics = [#tpu.dimension_semantics<parallel>], iteration_bounds = array<i64: 1>, scalar_prefetch = 0 : i64, scratch_operands = 0 : i64, tpu.core_type = #tpu.core_type<tc>, window_params = [{transform_indices = @transform_0, window_bounds = array<i64: 8, 896>}, {pipeline_mode = #tpu.pipeline_mode<synchronous>, transform_indices = @transform_1, window_bounds = array<i64: 896, 128>}, {pipeline_mode = #tpu.pipeline_mode<synchronous>, transform_indices = @transform_2, window_bounds = array<i64: 1, 128>}, {pipeline_mode = #tpu.pipeline_mode<synchronous>, transform_indices = @transform_3, window_bounds = array<i64: 128, 128>}, {pipeline_mode = #tpu.pipeline_mode<synchronous>, transform_indices = @transform_4, window_bounds = array<i64: 1, 128>}, {transform_indices = @transform_5, window_bounds = array<i64: 8, 128>}]} {
    %c0 = arith.constant 0 : index
    %c0_0 = arith.constant 0 : index
    %0 = vector.load %arg1[%c0, %c0_0] : memref<8x896xbf16, #tpu.memory_space<vmem>>, vector<8x896xbf16>
    %c0_1 = arith.constant 0 : index
    %c0_2 = arith.constant 0 : index
    %1 = vector.load %arg2[%c0_1, %c0_2] : memref<896x128xbf16, #tpu.memory_space<vmem>>, vector<896x128xbf16>
    %cst = arith.constant dense<0.000000e+00> : vector<8x128xf32>
    %2 = tpu.matmul %0, %1, %cst {dimension_numbers = #tpu.dot_dimension_numbers<[1], [0], [0], [1], [0, 0, 1, 1], [], []>} : vector<8x896xbf16>, vector<896x128xbf16>, vector<8x128xf32> -> vector<8x128xf32>
    %c0_3 = arith.constant 0 : index
    %c0_4 = arith.constant 0 : index
    %3 = vector.load %arg3[%c0_3, %c0_4] : memref<1x128xf32, #tpu.memory_space<vmem>>, vector<1x128xf32>
    %4 = vector.broadcast %3 : vector<1x128xf32> to vector<8x128xf32>
    %5 = arith.addf %2, %4 : vector<8x128xf32>
    %cst_5 = arith.constant 0.000000e+00 : f32
    %6 = vector.broadcast %cst_5 : f32 to vector<8x128xf32>
    %7 = arith.maximumf %5, %6 : vector<8x128xf32>
    %8 = arith.truncf %7 : vector<8x128xf32> to vector<8x128xbf16>
    %c0_6 = arith.constant 0 : index
    %c0_7 = arith.constant 0 : index
    %9 = vector.load %arg4[%c0_6, %c0_7] : memref<128x128xbf16, #tpu.memory_space<vmem>>, vector<128x128xbf16>
    %cst_8 = arith.constant dense<0.000000e+00> : vector<8x128xf32>
    %10 = tpu.matmul %8, %9, %cst_8 {dimension_numbers = #tpu.dot_dimension_numbers<[1], [0], [0], [1], [0, 0, 1, 1], [], []>} : vector<8x128xbf16>, vector<128x128xbf16>, vector<8x128xf32> -> vector<8x128xf32>
    %c0_9 = arith.constant 0 : index
    %c0_10 = arith.constant 0 : index
    %11 = vector.load %arg5[%c0_9, %c0_10] : memref<1x128xf32, #tpu.memory_space<vmem>>, vector<1x128xf32>
    %12 = vector.broadcast %11 : vector<1x128xf32> to vector<8x128xf32>
    %13 = arith.addf %10, %12 : vector<8x128xf32>
    %c0_11 = arith.constant 0 : index
    %c0_12 = arith.constant 0 : index
    %14 = vector.load %arg6[%c0_11, %c0_12] : memref<8x128xf32, #tpu.memory_space<vmem>>, vector<8x128xf32>
    tpu.vector_store %arg6[%c0_11, %c0_12], %13 {strides = array<i32>} : memref<8x128xf32, #tpu.memory_space<vmem>>, vector<8x128xf32>,
    return
  }
  func.func @transform_0(%arg0: i32) -> (i32, i32) {
    %c0_i32 = arith.constant 0 : i32
    %c0_i32_0 = arith.constant 0 : i32
    return %arg0, %c0_i32 : i32, i32
  }
  func.func @transform_1(%arg0: i32) -> (i32, i32) {
    %c0_i32 = arith.constant 0 : i32
    %c0_i32_0 = arith.constant 0 : i32
    %c0_i32_1 = arith.constant 0 : i32
    return %c0_i32, %c0_i32_0 : i32, i32
  }
  func.func @transform_2(%arg0: i32) -> (i32, i32) {
    %c0_i32 = arith.constant 0 : i32
    %c0_i32_0 = arith.constant 0 : i32
    %c0_i32_1 = arith.constant 0 : i32
    return %c0_i32, %c0_i32_0 : i32, i32
  }
  func.func @transform_3(%arg0: i32) -> (i32, i32) {
    %c0_i32 = arith.constant 0 : i32
    %c0_i32_0 = arith.constant 0 : i32
    %c0_i32_1 = arith.constant 0 : i32
    return %c0_i32, %c0_i32_0 : i32, i32
  }
  func.func @transform_4(%arg0: i32) -> (i32, i32) {
    %c0_i32 = arith.constant 0 : i32
    %c0_i32_0 = arith.constant 0 : i32
    %c0_i32_1 = arith.constant 0 : i32
    return %c0_i32, %c0_i32_0 : i32, i32
  }
  func.func @transform_5(%arg0: i32) -> (i32, i32) {
    %c0_i32 = arith.constant 0 : i32
    %c0_i32_0 = arith.constant 0 : i32
    return %arg0, %c0_i32 : i32, i32
  }
}

</mosaic_0001>

<bundles_post_ra>
// kernel: tpu_custom_call.1
= control target key start
LH: loop header
LB: loop body
LE: loop exit
PB: predicated region body
PF: predicated region fallthrough
CT: control target
= control target key end

     0   :  { %10 = vsyncpa [#allocation3], 0  ;;  %s1224_s0 = inlined_call_operand.hbm [shape: bf16[8,896], index: 0, kind: input, shape index: {}]   ;;  %s1225_s1 = inlined_call_operand.hbm [shape: bf16[896,128], index: 1, kind: input, shape index: {}]   ;;  %s1226_s2 = inlined_call_operand.vmem [shape: f32[1,128], index: 2, kind: input, shape index: {}]   ;;  %s1227_s3 = inlined_call_operand.hbm [shape: bf16[128,128], index: 3, kind: input, shape index: {}]   ;;  %s1228_s4 = inlined_call_operand.vmem [shape: f32[1,128], index: 4, kind: input, shape index: {}]   ;;  %s1229_s5 = inlined_call_operand.hbm [shape: f32[8,128], index: 5, kind: output, shape index: {}]  }
   0x1   :  { %11 = vsyncpa [#allocation6], 0  ;;  %s28_s20 = sshll.u32 %s1225_s1, 4  ;;  %s29_s20 = int_to_ptr.hbm [resolvable:$true] %s28_s20 }
   0x2   :  { %12 = vsyncpa [#allocation4], 0  ;;  %s1170_s21 = smov [#allocation5]   ;;  %s18_s25 = sshll.u32 %s1224_s0, 4  ;;  %s19_s25 = int_to_ptr.hbm [resolvable:$true] %s18_s25 }
   0x3   :  { %s30_s22 = sshll.u32 %s1170_s21, 4  ;;  %s1171_s26 = smov 64   ;;  %s31_s22 = int_to_ptr.vmem [resolvable:$true] %s30_s22 }
   0x4   :  { %s1172_s27 = smov 4   ;;  %s1173_s28 = smov [#allocation2]  }
   0x5   :  { %36 = dma.hbm_to_vmem [thread:$0]  %s29_s20, 7168, %s31_s22, [#allocation6], %s1171_s26, %s1171_s26, %s1172_s27  }
   0x6   :  { %s20_s29 = sshll.u32 %s1173_s28, 4  ;;  %s43_s7 = sshll.u32 %s1227_s3, 4  ;;  %s21_s29 = int_to_ptr.vmem [resolvable:$true] %s20_s29  ;;  %s44_s7 = int_to_ptr.hbm [resolvable:$true] %s43_s7 }
   0x7   :  { %23 = dma.hbm_to_vmem [thread:$0]  %s19_s25, 448, %s21_s29, [#allocation3]  }
   0x8   :  { %s1174_s1 = smov [#allocation7]  }
   0x9   :  { %s45_s8 = sshll.u32 %s1174_s1, 4  ;;  %s46_s8 = int_to_ptr.vmem [resolvable:$true] %s45_s8 }
   0xa   :  { %51 = dma.hbm_to_vmem [thread:$0]  %s44_s7, 1024, %s46_s8, [#allocation6], %s1171_s26, %s1171_s26, %s1172_s27  }
   0xb   :  { %1164 = dma.done.wait [#allocation3], 448  }
   0xc   :  { %1165 = vsyncadd [#allocation3], 4294966848 }
   0xd   :  { %1166 = dma.done.wait [#allocation6], 8192  }
   0xe   :  { %1167 = vsyncadd [#allocation6], 4294959104  ;;  %v1003_v0 = vld [vmem:[#allocation5 + $0x38] sm:$0xff]  ;;  %v1002_v3 = vld [vmem:[#allocation5 + $0x30] sm:$0xff]  ;;  %s1175_s10 = smov [#allocation8]   ;;  %s729_s14 = sshll.u32 %s1229_s5, 4  ;;  %s730_s14 = int_to_ptr.hbm [resolvable:$true] %s729_s14 }
   0xf   :  { %v1011_v1 = vld [vmem:[#allocation5 + $0x78] sm:$0xff]  ;;  %547 = vmatpush.bf16.msra.mxu0 %v1003_v0  ;;  %v1010_v4 = vld [vmem:[#allocation5 + $0x70] sm:$0xff]  ;;  %v1001_v7 = vld [vmem:[#allocation5 + $0x28] sm:$0xff]  ;;  %s727_s11 = sshll.u32 %s1175_s10, 4  ;;  %s728_s11 = int_to_ptr.vmem [resolvable:$true] %s727_s11 }
  0x10   :  { %v1019_v2 = vld [vmem:[#allocation5 + $0xb8] sm:$0xff]  ;;  %560 = vmatpush.bf16.msra.mxu1 %v1011_v1  ;;  %v1018_v5 = vld [vmem:[#allocation5 + $0xb0] sm:$0xff]  ;;  %v1009_v8 = vld [vmem:[#allocation5 + $0x68] sm:$0xff] }
  0x11   :  { %573 = vmatpush.bf16.msra.mxu2 %v1019_v2  ;;  %v1027_v6 = vld [vmem:[#allocation5 + $0xf8] sm:$0xff]  ;;  %v1017_v9 = vld [vmem:[#allocation5 + $0xa8] sm:$0xff]  ;;  %v1026_v10 = vld [vmem:[#allocation5 + $0xf0] sm:$0xff] }
  0x12   :  { %586 = vmatpush.bf16.msra.mxu3 %v1027_v6  ;;  %v1000_v11 = vld [vmem:[#allocation5 + $0x20] sm:$0xff]  ;;  %v1025_v14 = vld [vmem:[#allocation5 + $0xe8] sm:$0xff]  ;;  %v999_v15 = vld [vmem:[#allocation5 + $0x18] sm:$0xff] }
  0x13   :  { %548 = vmatpush.bf16.msra.mxu0 %v1002_v3  ;;  %v1008_v12 = vld [vmem:[#allocation5 + $0x60] sm:$0xff]  ;;  %v1007_v16 = vld [vmem:[#allocation5 + $0x58] sm:$0xff]  ;;  %v998_v19 = vld [vmem:[#allocation5 + $0x10] sm:$0xff] }
  0x14   :  { %561 = vmatpush.bf16.msra.mxu1 %v1010_v4  ;;  %v1016_v13 = vld [vmem:[#allocation5 + $0xa0] sm:$0xff]  ;;  %v1015_v17 = vld [vmem:[#allocation5 + $0x98] sm:$0xff]  ;;  %v1006_v20 = vld [vmem:[#allocation5 + $0x50] sm:$0xff] }
  0x15   :  { %574 = vmatpush.bf16.msra.mxu2 %v1018_v5  ;;  %v1024_v18 = vld [vmem:[#allocation5 + $0xe0] sm:$0xff]  ;;  %v1014_v21 = vld [vmem:[#allocation5 + $0x90] sm:$0xff]  ;;  %v1023_v22 = vld [vmem:[#allocation5 + $0xd8] sm:$0xff] }
  0x16   :  { %587 = vmatpush.bf16.msra.mxu3 %v1026_v10  ;;  %v997_v23 = vld [vmem:[#allocation5 + $0x8] sm:$0xff]  ;;  %v1022_v27 = vld [vmem:[#allocation5 + $0xd0] sm:$0xff]  ;;  %v996_v30 = vld [vmem:[#allocation5] sm:$0xff] }
  0x17   :  { %549 = vmatpush.bf16.msra.mxu0 %v1001_v7  ;;  %v1005_v24 = vld [vmem:[#allocation5 + $0x48] sm:$0xff]  ;;  %v1004_v31 = vld [vmem:[#allocation5 + $0x40] sm:$0xff]  ;;  %v1035_v35 = vld [vmem:[#allocation5 + $0x138] sm:$0xff] }
  0x18   :  { %562 = vmatpush.bf16.msra.mxu1 %v1009_v8  ;;  %v66_v25 = vld [vmem:[#allocation2] sm:$0xff]  ;;  %v67_v28 = vld [vmem:[#allocation2 + $0x8] sm:$0xff]  ;;  %v1043_v36 = vld [vmem:[#allocation5 + $0x178] sm:$0xff] }
  0x19   :  { %575 = vmatpush.bf16.msra.mxu2 %v1017_v9  ;;  %v1013_v26 = vld [vmem:[#allocation5 + $0x88] sm:$0xff]  ;;  %v190_v29 = vunpack.c.l.b16 %v66_v25  ;;  %v192_v32 = vunpack.c.l.b16 %v67_v28  ;;  %v191_v33 = vunpack.c.h.b16 %v66_v25  ;;  %v1012_v34 = vld [vmem:[#allocation5 + $0x80] sm:$0xff]  ;;  %v1051_v37 = vld [vmem:[#allocation5 + $0x1b8] sm:$0xff]  ;;  %v193_v46 = vunpack.c.h.b16 %v67_v28 }
  0x1a   :  { %588 = vmatpush.bf16.msra.mxu3 %v1025_v14  ;;  %v1021_v39 = vld [vmem:[#allocation5 + $0xc8] sm:$0xff]  ;;  %v1034_v42 = vld [vmem:[#allocation5 + $0x130] sm:$0xff]  ;;  %v1020_v45 = vld [vmem:[#allocation5 + $0xc0] sm:$0xff] }
  0x1b   :  { %550 = vmatpush.bf16.msra.mxu0 %v1000_v11  ;;  %v197_v38 = vpack.c.b16 %v190_v29, %v190_v29  ;;  %v199_v40 = vpack.c.b16 %v192_v32, %v192_v32  ;;  %v198_v41 = vpack.c.b16 %v191_v33, %v191_v33  ;;  %v1042_v43 = vld [vmem:[#allocation5 + $0x170] sm:$0xff]  ;;  %v1033_v47 = vld [vmem:[#allocation5 + $0x128] sm:$0xff]  ;;  %v200_v50 = vpack.c.b16 %v193_v46, %v193_v46  ;;  %v1032_v51 = vld [vmem:[#allocation5 + $0x120] sm:$0xff] }
  0x1c   :  { %563 = vmatpush.bf16.msra.mxu1 %v1008_v12  ;;  %v1050_v44 = vld [vmem:[#allocation5 + $0x1b0] sm:$0xff]  ;;  %v1041_v48 = vld [vmem:[#allocation5 + $0x168] sm:$0xff]  ;;  %v1040_v52 = vld [vmem:[#allocation5 + $0x160] sm:$0xff] }
  0x1d   :  { %576 = vmatpush.bf16.msra.mxu2 %v1016_v13  ;;  %v1049_v49 = vld [vmem:[#allocation5 + $0x1a8] sm:$0xff]  ;;  %v1048_v53 = vld [vmem:[#allocation5 + $0x1a0] sm:$0xff]  ;;  %v1031_v54 = vld [vmem:[#allocation5 + $0x118] sm:$0xff] }
  0x1e   :  { %589 = vmatpush.bf16.msra.mxu3 %v1024_v18  ;;  %v1039_v55 = vld [vmem:[#allocation5 + $0x158] sm:$0xff]  ;;  %v1030_v57 = vld [vmem:[#allocation5 + $0x110] sm:$0xff]  ;;  %v1029_v60 = vld [vmem:[#allocation5 + $0x108] sm:$0xff] }
  0x1f   :  { %551 = vmatpush.bf16.msra.mxu0 %v999_v15  ;;  %v1047_v56 = vld [vmem:[#allocation5 + $0x198] sm:$0xff]  ;;  %v1038_v58 = vld [vmem:[#allocation5 + $0x150] sm:$0xff]  ;;  %v1037_v62 = vld [vmem:[#allocation5 + $0x148] sm:$0xff] }
  0x20   :  { %564 = vmatpush.bf16.msra.mxu1 %v1007_v16  ;;  %v1046_v59 = vld [vmem:[#allocation5 + $0x190] sm:$0xff]  ;;  %v1045_v63 = vld [vmem:[#allocation5 + $0x188] sm:$0xff]  ;;  %v69_v0 = vld [vmem:[#allocation2 + $0x18] sm:$0xf] }
  0x21   :  { %577 = vmatpush.bf16.msra.mxu2 %v1015_v17  ;;  %v68_v61 = vld [vmem:[#allocation2 + $0x10] sm:$0xff]  ;;  %v1028_v2 = vld [vmem:[#allocation5 + $0x100] sm:$0xff]  ;;  %v196_v4 = vunpack.c.l.b16 %v69_v0  ;;  %v1057_v12 = vld [vmem:[#allocation7 + $0x28] sm:$0xff] }
  0x22   :  { %590 = vmatpush.bf16.msra.mxu3 %v1023_v22  ;;  %v194_v1 = vunpack.c.l.b16 %v68_v61  ;;  %v195_v3 = vunpack.c.h.b16 %v68_v61  ;;  %v1036_v5 = vld [vmem:[#allocation5 + $0x140] sm:$0xff]  ;;  %v1059_v10 = vld [vmem:[#allocation7 + $0x38] sm:$0xff]  ;;  %v1058_v11 = vld [vmem:[#allocation7 + $0x30] sm:$0xff] }
  0x23   :  { %552 = vmatpush.bf16.msra.mxu0 %v998_v19  ;;  %v1044_v6 = vld [vmem:[#allocation5 + $0x180] sm:$0xff]  ;;  %v203_v9 = vpack.c.b16 %v196_v4, %v196_v4  ;;  %v1055_v14 = vld [vmem:[#allocation7 + $0x18] sm:$0xff]  ;;  %v1054_v15 = vld [vmem:[#allocation7 + $0x10] sm:$0xff] }
  0x24   :  { %565 = vmatpush.bf16.msra.mxu1 %v1006_v20  ;;  %v201_v7 = vpack.c.b16 %v194_v1, %v194_v1  ;;  %v202_v8 = vpack.c.b16 %v195_v3, %v195_v3  ;;  %v1056_v13 = vld [vmem:[#allocation7 + $0x20] sm:$0xff]  ;;  %v1053_v18 = vld [vmem:[#allocation7 + $0x8] sm:$0xff] }
  0x25   :  { %578 = vmatpush.bf16.msra.mxu2 %v1014_v21  ;;  %v1052_v19 = vld [vmem:[#allocation7] sm:$0xff] }
  0x26   :  { %591 = vmatpush.bf16.msra.mxu3 %v1022_v27 }
  0x27   :  { %553 = vmatpush.bf16.msra.mxu0 %v997_v23  ;;  %v1066_v23 = vld [vmem:[%s1226_s2] ss:$0 sm:$0xff] }
  0x28   :  { %566 = vmatpush.bf16.msra.mxu1 %v1005_v24 }
  0x29   :  { %579 = vmatpush.bf16.msra.mxu2 %v1013_v26 }
  0x2a   :  { %592 = vmatpush.bf16.msra.mxu3 %v1021_v39 }
  0x2b   :  { %554 = vmatpush.bf16.msra.mxu0 %v996_v30 }
  0x2c   :  { %567 = vmatpush.bf16.msra.mxu1 %v1004_v31 }
  0x2d   :  { %580 = vmatpush.bf16.msra.mxu2 %v1012_v34 }
  0x2e   :  { %555 = vmatmul.bf16.vlgmr.msra.gmra.mxu0 %v197_v38  ;;  %593 = vmatpush.bf16.msra.mxu3 %v1020_v45 }
  0x2f   :  { %599 = vmatpush.bf16.msrb.mxu0 %v1035_v35  ;;  %568 = vmatmul.bf16.vlgmr.msra.gmra.mxu1 %v198_v41 }
  0x30   :  { %612 = vmatpush.bf16.msrb.mxu1 %v1043_v36  ;;  %581 = vmatmul.bf16.vlgmr.msra.gmra.mxu2 %v199_v40 }
  0x31   :  { %625 = vmatpush.bf16.msrb.mxu2 %v1051_v37  ;;  %594 = vmatmul.bf16.vlgmr.msra.gmra.mxu3 %v200_v50 }
  0x32   :  { %708 = vmatpush.bf16.msrb.mxu3 %v1059_v10 }
  0x33   :  { %600 = vmatpush.bf16.msrb.mxu0 %v1034_v42  ;;  %v1067_v42 = vld [vmem:[%s1228_s4] ss:$0 sm:$0xff] }
  0x34   :  { %613 = vmatpush.bf16.msrb.mxu1 %v1042_v43 }
  0x35   :  { %626 = vmatpush.bf16.msrb.mxu2 %v1050_v44 }
  0x36   :  { %709 = vmatpush.bf16.msrb.mxu3 %v1058_v11 }
  0x37   :  { %601 = vmatpush.bf16.msrb.mxu0 %v1033_v47 }
  0x38   :  { %614 = vmatpush.bf16.msrb.mxu1 %v1041_v48 }
  0x39   :  { %627 = vmatpush.bf16.msrb.mxu2 %v1049_v49 }
  0x3a   :  { %710 = vmatpush.bf16.msrb.mxu3 %v1057_v12 }
  0x3b   :  { %602 = vmatpush.bf16.msrb.mxu0 %v1032_v51 }
  0x3c   :  { %615 = vmatpush.bf16.msrb.mxu1 %v1040_v52 }
  0x3d   :  { %628 = vmatpush.bf16.msrb.mxu2 %v1048_v53 }
  0x3e   :  { %711 = vmatpush.bf16.msrb.mxu3 %v1056_v13 }
  0x3f   :  { %603 = vmatpush.bf16.msrb.mxu0 %v1031_v54 }
  0x40   :  { %616 = vmatpush.bf16.msrb.mxu1 %v1039_v55 }
  0x41   :  { %629 = vmatpush.bf16.msrb.mxu2 %v1047_v56 }
  0x42   :  { %712 = vmatpush.bf16.msrb.mxu3 %v1055_v14 }
  0x43   :  { %604 = vmatpush.bf16.msrb.mxu0 %v1030_v57 }
  0x44   :  { %617 = vmatpush.bf16.msrb.mxu1 %v1038_v58 }
  0x45   :  { %630 = vmatpush.bf16.msrb.mxu2 %v1046_v59 }
  0x46   :  { %713 = vmatpush.bf16.msrb.mxu3 %v1054_v15 }
  0x47   :  { %605 = vmatpush.bf16.msrb.mxu0 %v1029_v60 }
  0x48   :  { %618 = vmatpush.bf16.msrb.mxu1 %v1037_v62 }
  0x49   :  { %631 = vmatpush.bf16.msrb.mxu2 %v1045_v63 }
  0x4a   :  { %714 = vmatpush.bf16.msrb.mxu3 %v1053_v18 }
  0x4b   :  { %606 = vmatpush.bf16.msrb.mxu0 %v1028_v2 }
  0x4c   :  { %619 = vmatpush.bf16.msrb.mxu1 %v1036_v5 }
  0x4d   :  { %632 = vmatpush.bf16.msrb.mxu2 %v1044_v6 }
  0x4e   :  { %607 = vmatmul.bf16.vlgmr.msrb.gmra.mxu0 %v201_v7  ;;  %715 = vmatpush.bf16.msrb.mxu3 %v1052_v19 }
  0x4f   :  { %620 = vmatmul.bf16.vlgmr.msrb.gmra.mxu1 %v202_v8 }
  0x50   :  { %633 = vmatmul.bf16.vlgmr.msrb.gmra.mxu2 %v203_v9 }
  0xab   :  { %v556_v16 = vpop.f32.mrf.mxu0 }
  0xac   :  { %v569_v17 = vpop.f32.mrf.mxu1  ;;  %v557_v26 = vadd.f32 %v1066_v23, %v556_v16 }
  0xae   :  { %v570_v27 = vadd.f32 %v569_v17, %v557_v26 }
  0xb3   :  { %v582_v20 = vpop.f32.mrf.mxu2  ;;  %v558_v21 = vpop.f32.mrf.mxu0 }
  0xb4   :  { %v571_v22 = vpop.f32.mrf.mxu1  ;;  %v595_v24 = vpop.f32.mrf.mxu3  ;;  %v583_v29 = vadd.f32 %v582_v20, %v570_v27 }
  0xb6   :  { %v596_v30 = vadd.f32 %v595_v24, %v583_v29 }
  0xbb   :  { %v584_v25 = vpop.f32.mrf.mxu2 }
  0xbc   :  { %v597_v28 = vpop.f32.mrf.mxu3 }
  0xcb   :  { %v608_v31 = vpop.f32.mrf.mxu0 }
  0xcc   :  { %v621_v32 = vpop.f32.mrf.mxu1  ;;  %v609_v33 = vadd.f32 %v608_v31, %v596_v30 }
  0xce   :  { %v622_v34 = vadd.f32 %v621_v32, %v609_v33 }
  0xd3   :  { %v634_v35 = vpop.f32.mrf.mxu2  ;;  %v610_v37 = vpop.f32.mrf.mxu0 }
  0xd4   :  { %v635_v36 = vadd.f32 %v634_v35, %v622_v34  ;;  %v623_v38 = vpop.f32.mrf.mxu1 }
  0xd6   :  { %v638_v39 = vmax.f32 %v635_v36, 0.0 }
  0xd8   :  { %v639_v40 = vpack.c.bf16 %v638_v39, %v638_v39 }
  0xda   :  { %716 = vmatmul.bf16.vlgmr.msrb.gmra.mxu3 %v639_v40 }
  0xdb   :  { %v636_v41 = vpop.f32.mrf.mxu2 }
 0x15d   :  { %v717_v43 = vpop.f32.mrf.mxu3 }
 0x15e   :  { %v718_v44 = vadd.f32 %v1067_v42, %v717_v43 }
 0x160   :  { %721 = vst [vmem:[#allocation8] sm:$0xff] %v718_v44 }
 0x161   :  { %732 = dma.vmem_to_hbm [thread:$0]  %s728_s11, 128, %s730_s14, [#allocation4]  }
 0x165   :  { %v719_v45 = vpop.f32.mrf.mxu3 }
 0x166   :  { %1168 = dma.done.wait [#allocation4], 128  }
 0x167   :  { %1169 = vsyncadd [#allocation4], 4294967168 }
 0x168   :  { %737 = vsyncpa [#allocation3], 1 }
 0x169   :  { %738 = vsyncpa [#allocation6], 1 }
 0x16a   :  { %739 = vsyncpa [#allocation4], 1 }

</bundles_post_ra>
